<compile_context>
chip_gen: v5e
topology: v5e:2x2
jax: 0.10.0
libtpu: 0.0.40
codegen_flags: <defaults>
</compile_context>

<pallas_src>
import functools
import math

import jax
import jax.numpy as jnp
from jax.experimental import pallas as pl
from jax.experimental.pallas import tpu as pltpu


# ---------------------------------------------------------------------------
# VMEM budget (physical-VMEM aware; conservative fallback == v7x's 64 MiB).
# ---------------------------------------------------------------------------
def _vmem_budget_bytes() -> int:
    try:
        cap = int(pltpu.get_tpu_info().vmem_capacity_bytes)
    except Exception:
        cap = 64 * 1024 * 1024
    return (cap * 5) // 8          # ~40 MiB on v7x, ~80 MiB on v5e/v6e


def _fused_vmem_bytes(C, W, H, oW, oH, itemsize):
    return (2 * itemsize * (C * W * H + oW * W + H * oH)   # x2 / A / Bt (double-buffered)
            + 2 * 4 * C * oW * oH                          # f32 output (double-buffered)
            + itemsize * W * oH                            # per-channel scratch
            + 4 * (W * oH + oW * oH))                      # live f32 dot results


# ---------------------------------------------------------------------------
# Fused kernel: whole problem in a single invocation (small / medium planes).
#   x2:(C*W,H)  A:(oW,W)  Bt:(H,oH)  out:(C*oW,oH)  t:(W,oH) scratch (operand dtype)
# ---------------------------------------------------------------------------
def _sr_fused_kernel(x2_ref, a_ref, bt_ref, o_ref, t_ref, *, C, W, oW):
    a = a_ref[...]
    bt = bt_ref[...]
    for c in range(C):  # C == 3, statically unrolled; scratch bounds the live range
        t_ref[...] = jnp.dot(x2_ref[pl.ds(c * W, W), :], bt,
                             preferred_element_type=jnp.float32).astype(t_ref.dtype)
        o_ref[pl.ds(c * oW, oW), :] = jnp.dot(
            a, t_ref[...], preferred_element_type=jnp.float32).astype(o_ref.dtype)


def _bilinear_sr_fused(x2, A, Bt, *, vmem_limit):
    CW, H = x2.shape
    oW, W = A.shape
    oH = Bt.shape[1]
    C = CW // W
    kernel = functools.partial(_sr_fused_kernel, C=C, W=W, oW=oW)
    return pl.pallas_call(
        kernel,
        out_shape=jax.ShapeDtypeStruct((C * oW, oH), jnp.float32),
        grid=(1,),
        in_specs=[
            pl.BlockSpec((CW, H), lambda i: (0, 0)),
            pl.BlockSpec((oW, W), lambda i: (0, 0)),
            pl.BlockSpec((H, oH), lambda i: (0, 0)),
        ],
        out_specs=pl.BlockSpec((C * oW, oH), lambda i: (0, 0)),
        scratch_shapes=[pltpu.VMEM((W, oH), x2.dtype)],
        compiler_params=pltpu.CompilerParams(
            dimension_semantics=("arbitrary",),
            vmem_limit_bytes=int(vmem_limit)),
    )(x2, A, Bt)


# ---------------------------------------------------------------------------
# Tiled path, stage 1:  T = x @ B^T      (rows of (C*W, H), fully parallel grid)
# ---------------------------------------------------------------------------
def _sr_stage1_kernel(x_ref, bt_ref, t_ref):
    t_ref[...] = jnp.dot(x_ref[...], bt_ref[...],
                         preferred_element_type=jnp.float32).astype(t_ref.dtype)


def _bilinear_sr_stage1(x2, Bt, tile_r, *, vmem_limit):
    CW, H = x2.shape
    oH = Bt.shape[1]
    return pl.pallas_call(
        _sr_stage1_kernel,
        out_shape=jax.ShapeDtypeStruct((CW, oH), x2.dtype),   # keep operand dtype
        grid=(CW // tile_r,),
        in_specs=[
            pl.BlockSpec((tile_r, H), lambda r: (r, 0)),
            pl.BlockSpec((H, oH), lambda r: (0, 0)),
        ],
        out_specs=pl.BlockSpec((tile_r, oH), lambda r: (r, 0)),
        compiler_params=pltpu.CompilerParams(
            dimension_semantics=("parallel",),
            vmem_limit_bytes=int(vmem_limit)),
    )(x2, Bt)


# ---------------------------------------------------------------------------
# Tiled path, stage 2:  out[c] = A @ T[c]    grid (C, oW/tile_m, oH/tile_n),
# all axes "parallel" (no scratch sharing -> megacore-balanced on v7x).
# ---------------------------------------------------------------------------
def _sr_stage2_kernel(a_ref, t_ref, o_ref):
    o_ref[...] = jnp.dot(a_ref[...], t_ref[...],
                         preferred_element_type=jnp.float32).astype(o_ref.dtype)


def _bilinear_sr_stage2(T, A, tile_m, tile_n, *, vmem_limit):
    C, W, oH = T.shape
    oW = A.shape[0]
    return pl.pallas_call(
        _sr_stage2_kernel,
        out_shape=jax.ShapeDtypeStruct((C, oW, oH), jnp.float32),
        grid=(C, oW // tile_m, oH // tile_n),
        in_specs=[
            pl.BlockSpec((tile_m, W), lambda c, j, p: (j, 0)),
            pl.BlockSpec((None, W, tile_n), lambda c, j, p: (c, 0, p)),
        ],
        out_specs=pl.BlockSpec((None, tile_m, tile_n), lambda c, j, p: (c, j, p)),
        compiler_params=pltpu.CompilerParams(
            dimension_semantics=("parallel", "parallel", "parallel"),
            vmem_limit_bytes=int(vmem_limit)),
    )(A, T)


# ---------------------------------------------------------------------------
# Tile choosers / validation.
# ---------------------------------------------------------------------------
def _row_tile(total, granularity, target=256):
    """Largest divisor of `total` that is a multiple of `granularity`, <= target,
    preferring at least two grid blocks; falls back to the full extent."""
    divs = [d for d in range(granularity, total + 1, granularity) if total % d == 0]
    if not divs:
        return total
    good = ([d for d in divs if d <= target and d < total]
            or [d for d in divs if d <= target])
    return max(good) if good else min(divs)


def _auto_stage1_tile(CW, H, oH, itemsize, granularity, budget):
    tile_r = _row_tile(CW, granularity)

    def need(tr):
        return 2 * itemsize * (tr * H + H * oH + tr * oH) + 4 * tr * oH

    while need(tile_r) > budget and tile_r % (2 * granularity) == 0:
        tile_r //= 2
    return tile_r


def _auto_stage2_tiles(oW, oH, W, itemsize, granularity, budget):
    tile_m = _row_tile(oW, granularity)

    def need(tn):
        return (2 * itemsize * (tile_m * W + W * tn)   # A / T blocks (double-buffered)
                + 2 * 4 * tile_m * tn                  # f32 out block (double-buffered)
                + 4 * tile_m * tn)                     # live f32 dot result

    # Keep the full (lane-dense) oH when it fits, else the largest multiple of
    # 128 dividing oH (stores stay unmasked vst).
    cands = [oH] + [d for d in range((oH // 128) * 128, 127, -128) if oH % d == 0]
    tile_n = next((t for t in cands if need(t) <= budget), cands[-1])
    return tile_m, tile_n


def _check_tile(total, tile, granularity, name):
    if total % tile != 0:
        raise ValueError(f"{name}={tile} must divide {total}")
    if tile != total and tile % granularity != 0:
        raise ValueError(f"{name}={tile} must be a multiple of {granularity} "
                         f"(or the full extent {total})")


# ---------------------------------------------------------------------------
# Bilinear (align_corners=False) interpolation matrix.
# ---------------------------------------------------------------------------
def bilinear_matrix(in_size: int, out_size: int, scale_factor: float) -> jnp.ndarray:
    """Row-interpolation matrix M (out_size, in_size): out = M @ in.

    Matches F.interpolate(mode='bilinear', align_corners=False, scale_factor=s)
    (source index uses 1/s).  antialias=True is identical when upsampling."""
    scale = 1.0 / float(scale_factor)
    i = jnp.arange(out_size, dtype=jnp.float32)
    real = jnp.maximum((i + 0.5) * scale - 0.5, 0.0)
    i0 = jnp.minimum(jnp.floor(real).astype(jnp.int32), in_size - 1)
    i1 = jnp.minimum(i0 + 1, in_size - 1)
    lam = real - i0.astype(jnp.float32)
    rows = jnp.arange(out_size)
    M = jnp.zeros((out_size, in_size), jnp.float32)
    M = M.at[rows, i0].add(1.0 - lam)
    M = M.at[rows, i1].add(lam)
    return M


# ---------------------------------------------------------------------------
# SR_Module forward (sr_method='Bilinear').
# ---------------------------------------------------------------------------
def sr_module_forward(cam_params, feat_maps, img_wh, sr_ratio=2.0, *,
                      impl="auto", operand_dtype=None,
                      tile_m=None, tile_n=None, tile_r=None):
    """impl: 'auto' | 'xla' | 'fused' | 'tiled'.
    operand_dtype: None (auto: bf16 for large planes, f32 otherwise) or a dtype;
    accumulation is always f32 inside the kernels."""
    del cam_params  # unused by the Bilinear branch (signature parity)
    W, H = img_wh

    if sr_ratio == 1:
        return feat_maps[:, :3]
    assert sr_ratio > 1, ("antialiased bilinear == plain bilinear only holds for "
                          "upsampling (sr_ratio > 1)")

    C = 3
    oW = int(math.floor(W * sr_ratio))
    oH = int(math.floor(H * sr_ratio))

    if operand_dtype is None:
        operand_dtype = jnp.bfloat16 if (W * H >= 512 * 512) else jnp.float32
    operand_dtype = jnp.dtype(operand_dtype)
    itemsize = operand_dtype.itemsize
    granularity = 8 if itemsize >= 4 else 16        # sublane rows per tile (f32 / bf16)

    budget = _vmem_budget_bytes()

    A = bilinear_matrix(W, oW, sr_ratio).astype(operand_dtype)      # (oW, W)
    Bt = bilinear_matrix(H, oH, sr_ratio).T.astype(operand_dtype)   # (H, oH)

    # feat_maps: (W*H, Cfeat) -> channel-major planes.  (This small transpose and
    # the final (-1, 3) permute stay in XLA: they are tiny next to the r^2-larger
    # output and the (N, 3) output layout is fixed by the PyTorch contract.)
    rgbs = feat_maps[:, :C].T.astype(operand_dtype)                  # (3, W*H)

    if impl == "auto":
        if W * H <= 128 * 128:
            impl = "xla"      # custom-call launch overhead dominates tiny planes
        elif (oW * oH <= 512 * 512
              and _fused_vmem_bytes(C, W, H, oW, oH, itemsize) <= budget):
            impl = "fused"
        else:
            impl = "tiled"    # fused is a single-TC, zero-overlap invocation

    if impl == "xla":
        x3 = rgbs.reshape(C, W, H).astype(jnp.float32)
        sr = jnp.einsum("ow,cwh,hp->cop", A.astype(jnp.float32), x3,
                        Bt.astype(jnp.float32))                      # (C, oW, oH)
    elif impl == "fused":
        x2 = rgbs.reshape(C * W, H)
        sr = _bilinear_sr_fused(x2, A, Bt, vmem_limit=budget).reshape(C, oW, oH)
    elif impl == "tiled":
        x2 = rgbs.reshape(C * W, H)
        if tile_r is None:
            tile_r = _auto_stage1_tile(C * W, H, oH, itemsize, granularity, budget)
        if tile_m is None or tile_n is None:
            auto_m, auto_n = _auto_stage2_tiles(oW, oH, W, itemsize, granularity, budget)
            tile_m = auto_m if tile_m is None else tile_m
            tile_n = auto_n if tile_n is None else tile_n
        _check_tile(C * W, tile_r, granularity, "tile_r")
        _check_tile(oW, tile_m, granularity, "tile_m")
        _check_tile(oH, tile_n, 128, "tile_n")
        T = _bilinear_sr_stage1(x2, Bt, tile_r, vmem_limit=budget)   # (C*W, oH)
        T = T.reshape(C, W, oH)
        sr = _bilinear_sr_stage2(T, A, tile_m, tile_n, vmem_limit=budget)
    else:
        raise ValueError(f"unknown impl {impl!r}")

    # torch: sr_image.permute(0, 2, 3, 1).view(-1, 3)
    return jnp.transpose(sr, (1, 2, 0)).reshape(-1, 3).astype(jnp.float32)


if __name__ == "__main__":
    key = jax.random.PRNGKey(0)
    k1, k2 = jax.random.split(key)

    W, H = 16, 16
    C_feat = 32            # self.channels in the module
    sr_ratio = 2.0

    feat_maps = jax.random.normal(k1, (W * H, C_feat), dtype=jnp.float32)  # (256, 32)
    cam_params = jax.random.normal(k2, (25,), dtype=jnp.float32)           # unused
    img_wh = (W, H)

    # Exercise all Pallas paths (the 'auto' heuristic picks XLA at this size).
    out_fused = jax.block_until_ready(
        sr_module_forward(cam_params, feat_maps, img_wh, sr_ratio, impl="fused"))
    out_tiled = jax.block_until_ready(
        sr_module_forward(cam_params, feat_maps, img_wh, sr_ratio,
                          impl="tiled", tile_m=16, tile_r=16))
    out_bf16 = jax.block_until_ready(
        sr_module_forward(cam_params, feat_maps, img_wh, sr_ratio,
                          impl="tiled", operand_dtype=jnp.bfloat16,
                          tile_m=16, tile_r=16))

    # Pure-JAX reference of the same separable bilinear resize.
    oW, oH = int(W * sr_ratio), int(H * sr_ratio)
    A = bilinear_matrix(W, oW, sr_ratio)
    B = bilinear_matrix(H, oH, sr_ratio)
    x3 = feat_maps[:, :3].T.reshape(3, W, H)
    ref = jnp.einsum("ow,cwh,ph->cop", A, x3, B)
    ref = jnp.transpose(ref, (1, 2, 0)).reshape(-1, 3)

    assert out_fused.shape == (oW * oH, 3), out_fused.shape
    assert out_tiled.shape == (oW * oH, 3), out_tiled.shape
    assert out_bf16.shape == (oW * oH, 3), out_bf16.shape
    assert jnp.allclose(out_fused, ref, atol=1e-4, rtol=1e-4), "fused mismatch"
    assert jnp.allclose(out_tiled, ref, atol=1e-4, rtol=1e-4), "tiled mismatch"
    assert jnp.allclose(out_bf16, ref, atol=5e-2, rtol=5e-2), "bf16 tiled mismatch"

    print("KERNEL_OK")
</pallas_src>

<mosaic_0001>
module attributes {stable_mosaic.version = 11 : i64} {
  func.func @_sr_fused_kernel(%arg0: i32, %arg1: memref<48x16xf32, #tpu.memory_space<vmem>>, %arg2: memref<32x16xf32, #tpu.memory_space<vmem>>, %arg3: memref<16x32xf32, #tpu.memory_space<vmem>>, %arg4: memref<96x32xf32, #tpu.memory_space<vmem>>, %arg5: memref<16x32xf32, #tpu.memory_space<vmem>>) attributes {dimension_semantics = [#tpu.dimension_semantics<arbitrary>], iteration_bounds = array<i64: 1>, scalar_prefetch = 0 : i64, scratch_operands = 1 : i64, tpu.core_type = #tpu.core_type<tc>, window_params = [{pipeline_mode = #tpu.pipeline_mode<synchronous>, transform_indices = @transform_0, window_bounds = array<i64: 48, 16>}, {pipeline_mode = #tpu.pipeline_mode<synchronous>, transform_indices = @transform_1, window_bounds = array<i64: 32, 16>}, {pipeline_mode = #tpu.pipeline_mode<synchronous>, transform_indices = @transform_2, window_bounds = array<i64: 16, 32>}, {pipeline_mode = #tpu.pipeline_mode<synchronous>, transform_indices = @transform_3, window_bounds = array<i64: 96, 32>}]} {
    %c0 = arith.constant 0 : index
    %c0_0 = arith.constant 0 : index
    %0 = vector.load %arg2[%c0, %c0_0] : memref<32x16xf32, #tpu.memory_space<vmem>>, vector<32x16xf32>
    %c0_1 = arith.constant 0 : index
    %c0_2 = arith.constant 0 : index
    %1 = vector.load %arg3[%c0_1, %c0_2] : memref<16x32xf32, #tpu.memory_space<vmem>>, vector<16x32xf32>
    %c0_3 = arith.constant 0 : index
    %c0_4 = arith.constant 0 : index
    %2 = vector.load %arg1[%c0_3, %c0_4] : memref<48x16xf32, #tpu.memory_space<vmem>>, vector<16x16xf32>
    %cst = arith.constant dense<0.000000e+00> : vector<16x32xf32>
    %3 = tpu.matmul %2, %1, %cst {dimension_numbers = #tpu.dot_dimension_numbers<[1], [0], [0], [1], [0, 0, 1, 1], [], []>} : vector<16x16xf32>, vector<16x32xf32>, vector<16x32xf32> -> vector<16x32xf32>
    %c0_5 = arith.constant 0 : index
    %c0_6 = arith.constant 0 : index
    %4 = vector.load %arg5[%c0_5, %c0_6] : memref<16x32xf32, #tpu.memory_space<vmem>>, vector<16x32xf32>
    tpu.vector_store %arg5[%c0_5, %c0_6], %3 {strides = array<i32>} : memref<16x32xf32, #tpu.memory_space<vmem>>, vector<16x32xf32>,
    %c0_7 = arith.constant 0 : index
    %c0_8 = arith.constant 0 : index
    %5 = vector.load %arg5[%c0_7, %c0_8] : memref<16x32xf32, #tpu.memory_space<vmem>>, vector<16x32xf32>
    %cst_9 = arith.constant dense<0.000000e+00> : vector<32x32xf32>
    %6 = tpu.matmul %0, %5, %cst_9 {dimension_numbers = #tpu.dot_dimension_numbers<[1], [0], [0], [1], [0, 0, 1, 1], [], []>} : vector<32x16xf32>, vector<16x32xf32>, vector<32x32xf32> -> vector<32x32xf32>
    %c0_10 = arith.constant 0 : index
    %c0_11 = arith.constant 0 : index
    %7 = vector.load %arg4[%c0_10, %c0_11] : memref<96x32xf32, #tpu.memory_space<vmem>>, vector<32x32xf32>
    tpu.vector_store %arg4[%c0_10, %c0_11], %6 {strides = array<i32>} : memref<96x32xf32, #tpu.memory_space<vmem>>, vector<32x32xf32>,
    %c16 = arith.constant 16 : index
    %c0_12 = arith.constant 0 : index
    %8 = vector.load %arg1[%c16, %c0_12] : memref<48x16xf32, #tpu.memory_space<vmem>>, vector<16x16xf32>
    %cst_13 = arith.constant dense<0.000000e+00> : vector<16x32xf32>
    %9 = tpu.matmul %8, %1, %cst_13 {dimension_numbers = #tpu.dot_dimension_numbers<[1], [0], [0], [1], [0, 0, 1, 1], [], []>} : vector<16x16xf32>, vector<16x32xf32>, vector<16x32xf32> -> vector<16x32xf32>
    %c0_14 = arith.constant 0 : index
    %c0_15 = arith.constant 0 : index
    %10 = vector.load %arg5[%c0_14, %c0_15] : memref<16x32xf32, #tpu.memory_space<vmem>>, vector<16x32xf32>
    tpu.vector_store %arg5[%c0_14, %c0_15], %9 {strides = array<i32>} : memref<16x32xf32, #tpu.memory_space<vmem>>, vector<16x32xf32>,
    %c0_16 = arith.constant 0 : index
    %c0_17 = arith.constant 0 : index
    %11 = vector.load %arg5[%c0_16, %c0_17] : memref<16x32xf32, #tpu.memory_space<vmem>>, vector<16x32xf32>
    %cst_18 = arith.constant dense<0.000000e+00> : vector<32x32xf32>
    %12 = tpu.matmul %0, %11, %cst_18 {dimension_numbers = #tpu.dot_dimension_numbers<[1], [0], [0], [1], [0, 0, 1, 1], [], []>} : vector<32x16xf32>, vector<16x32xf32>, vector<32x32xf32> -> vector<32x32xf32>
    %c32 = arith.constant 32 : index
    %c0_19 = arith.constant 0 : index
    %13 = vector.load %arg4[%c32, %c0_19] : memref<96x32xf32, #tpu.memory_space<vmem>>, vector<32x32xf32>
    tpu.vector_store %arg4[%c32, %c0_19], %12 {strides = array<i32>} : memref<96x32xf32, #tpu.memory_space<vmem>>, vector<32x32xf32>,
    %c32_20 = arith.constant 32 : index
    %c0_21 = arith.constant 0 : index
    %14 = vector.load %arg1[%c32_20, %c0_21] : memref<48x16xf32, #tpu.memory_space<vmem>>, vector<16x16xf32>
    %cst_22 = arith.constant dense<0.000000e+00> : vector<16x32xf32>
    %15 = tpu.matmul %14, %1, %cst_22 {dimension_numbers = #tpu.dot_dimension_numbers<[1], [0], [0], [1], [0, 0, 1, 1], [], []>} : vector<16x16xf32>, vector<16x32xf32>, vector<16x32xf32> -> vector<16x32xf32>
    %c0_23 = arith.constant 0 : index
    %c0_24 = arith.constant 0 : index
    %16 = vector.load %arg5[%c0_23, %c0_24] : memref<16x32xf32, #tpu.memory_space<vmem>>, vector<16x32xf32>
    tpu.vector_store %arg5[%c0_23, %c0_24], %15 {strides = array<i32>} : memref<16x32xf32, #tpu.memory_space<vmem>>, vector<16x32xf32>,
    %c0_25 = arith.constant 0 : index
    %c0_26 = arith.constant 0 : index
    %17 = vector.load %arg5[%c0_25, %c0_26] : memref<16x32xf32, #tpu.memory_space<vmem>>, vector<16x32xf32>
    %cst_27 = arith.constant dense<0.000000e+00> : vector<32x32xf32>
    %18 = tpu.matmul %0, %17, %cst_27 {dimension_numbers = #tpu.dot_dimension_numbers<[1], [0], [0], [1], [0, 0, 1, 1], [], []>} : vector<32x16xf32>, vector<16x32xf32>, vector<32x32xf32> -> vector<32x32xf32>
    %c64 = arith.constant 64 : index
    %c0_28 = arith.constant 0 : index
    %19 = vector.load %arg4[%c64, %c0_28] : memref<96x32xf32, #tpu.memory_space<vmem>>, vector<32x32xf32>
    tpu.vector_store %arg4[%c64, %c0_28], %18 {strides = array<i32>} : memref<96x32xf32, #tpu.memory_space<vmem>>, vector<32x32xf32>,
    return
  }
  func.func @transform_0(%arg0: i32) -> (i32, i32) {
    %c0_i32 = arith.constant 0 : i32
    %c0_i32_0 = arith.constant 0 : i32
    %c0_i32_1 = arith.constant 0 : i32
    return %c0_i32, %c0_i32_0 : i32, i32
  }
  func.func @transform_1(%arg0: i32) -> (i32, i32) {
    %c0_i32 = arith.constant 0 : i32
    %c0_i32_0 = arith.constant 0 : i32
    %c0_i32_1 = arith.constant 0 : i32
    return %c0_i32, %c0_i32_0 : i32, i32
  }
  func.func @transform_2(%arg0: i32) -> (i32, i32) {
    %c0_i32 = arith.constant 0 : i32
    %c0_i32_0 = arith.constant 0 : i32
    %c0_i32_1 = arith.constant 0 : i32
    return %c0_i32, %c0_i32_0 : i32, i32
  }
  func.func @transform_3(%arg0: i32) -> (i32, i32) {
    %c0_i32 = arith.constant 0 : i32
    %c0_i32_0 = arith.constant 0 : i32
    %c0_i32_1 = arith.constant 0 : i32
    return %c0_i32, %c0_i32_0 : i32, i32
  }
}

</mosaic_0001>

<bundles_post_ra>
// kernel: tpu_custom_call.1
= control target key start
LH: loop header
LB: loop body
LE: loop exit
PB: predicated region body
PF: predicated region fallthrough
CT: control target
= control target key end

     0   :  { %vm22_vm0 = vcmask 130048   ;;  %vm52_vm1 = vcmask 261120   ;;  %s390_s2 = inlined_call_operand.vmem [shape: f32[16,32], index: 2, kind: input, shape index: {}]   ;;  %s391_s0 = inlined_call_operand.vmem [shape: f32[48,16], index: 0, kind: input, shape index: {}]   ;;  %s392_s1 = inlined_call_operand.vmem [shape: f32[32,16], index: 1, kind: input, shape index: {}]   ;;  %s393_s3 = inlined_call_operand.vmem [shape: f32[96,32], index: 3, kind: output, shape index: {}]  }
   0x1   :  { %v19_v0 = vld [vmem:[%s390_s2 + $0x8] sm:$0xff]  ;;  %v18_v1 = vld [vmem:[%s390_s2] sm:$0xff]  ;;  %v103_v3 = vld [vmem:[%s391_s0 + $0x18] sm:$0xff] }
   0x2   :  { %43 = vmatpush.msra.mxu0 %v19_v0  ;;  %v20_v2 = vld [vmem:[%s391_s0] sm:$0xff]  ;;  %260 = vmatpush.msra.mxu2 %v19_v0  ;;  %v21_v4 = vld [vmem:[%s391_s0 + $0x8] sm:$0xff]  ;;  %v102_v5 = vld [vmem:[%s391_s0 + $0x10] sm:$0xff] }
   0x3   :  { %v170_v6 = vld [vmem:[%s391_s0 + $0x20] sm:$0xff]  ;;  %v171_v7 = vld [vmem:[%s391_s0 + $0x28] sm:$0xff]  ;;  %v16_v20 = vld [vmem:[%s392_s1 + $0x10] sm:$0xff] }
   0x4   :  { %44 = vmatpush.msra.mxu0 %v18_v1  ;;  %261 = vmatpush.msra.mxu2 %v18_v1  ;;  %v14_v14 = vld [vmem:[%s392_s1] sm:$0xff]  ;;  %v15_v18 = vld [vmem:[%s392_s1 + $0x8] sm:$0xff]  ;;  %v17_v23 = vld [vmem:[%s392_s1 + $0x18] sm:$0xff] }
   0x5   :  { %242 = vmatmul.msk.f32.vlgmr.msra.gmra.mxu0 %vm22_vm0, %v20_v2  ;;  %249 = vmatmul.msk.f32.vlgmr.msra.gmra.mxu2 %vm22_vm0, %v103_v3 }
   0x6   :  { %124 = vmatpush.msrb.mxu0 %v19_v0 }
   0x8   :  { %125 = vmatpush.msrb.mxu0 %v18_v1 }
   0xa   :  { %192 = vmatpush.msra.mxu0 %v19_v0 }
   0xc   :  { %193 = vmatpush.msra.mxu0 %v18_v1 }
   0xd   :  { %243 = vmatmul.msk.f32.gmra.mxu0 %vm22_vm0, %v21_v4 }
  0x15   :  { %248 = vmatmul.msk.f32.vlgmr.msrb.gmra.mxu0 %vm22_vm0, %v102_v5 }
  0x1d   :  { %254 = vmatmul.msk.f32.vlgmr.msra.gmra.mxu0 %vm22_vm0, %v170_v6 }
  0x25   :  { %255 = vmatmul.msk.f32.gmra.mxu0 %vm22_vm0, %v171_v7 }
  0x82   :  { %v46_v8 = vpop.f32.mrf.mxu0 }
  0x83   :  { %53 = vst.msk [vmem:[#allocation2] sm:$0xff] %vm52_vm1, %v46_v8 }
  0x88   :  { %v130_v10 = vpop.f32.mrf.mxu2 }
  0x8a   :  { %v49_v9 = vpop.f32.mrf.mxu0  ;;  %v55_v13 = vld [vmem:[#allocation2] sm:$0xff] }
  0x8b   :  { %54 = vst.msk [vmem:[#allocation2 + $0x8] sm:$0xff] %vm52_vm1, %v49_v9 }
  0x92   :  { %v127_v11 = vpop.f32.mrf.mxu0  ;;  %v56_v12 = vld [vmem:[#allocation2 + $0x8] sm:$0xff] }
  0x93   :  { %83 = vmatpush.msra.mxu1 %v56_v12  ;;  %134 = vst.msk [vmem:[#allocation2 + $0x8] sm:$0xff] %vm52_vm1, %v130_v10 }
  0x94   :  { %133 = vst.msk [vmem:[#allocation2] sm:$0xff] %vm52_vm1, %v127_v11 }
  0x95   :  { %84 = vmatpush.msra.mxu1 %v55_v13 }
  0x96   :  { %244 = vmatmul.msk.f32.vlgmr.msra.gmra.mxu1 %vm22_vm0, %v14_v14 }
  0x9a   :  { %v195_v15 = vpop.f32.mrf.mxu0  ;;  %v136_v16 = vld [vmem:[#allocation2 + $0x8] sm:$0xff] }
  0x9b   :  { %151 = vmatpush.msra.mxu3 %v136_v16  ;;  %v135_v17 = vld [vmem:[#allocation2] sm:$0xff] }
  0x9c   :  { %201 = vst.msk [vmem:[#allocation2] sm:$0xff] %vm52_vm1, %v195_v15 }
  0x9d   :  { %152 = vmatpush.msra.mxu3 %v135_v17 }
  0x9e   :  { %250 = vmatmul.msk.f32.vlgmr.msra.gmra.mxu3 %vm22_vm0, %v14_v14  ;;  %245 = vmatmul.msk.f32.gmra.mxu1 %vm22_vm0, %v15_v18 }
  0xa2   :  { %v198_v19 = vpop.f32.mrf.mxu0 }
  0xa3   :  { %202 = vst.msk [vmem:[#allocation2 + $0x8] sm:$0xff] %vm52_vm1, %v198_v19  ;;  %v203_v22 = vld [vmem:[#allocation2] sm:$0xff] }
  0xa6   :  { %251 = vmatmul.msk.f32.gmra.mxu3 %vm22_vm0, %v15_v18  ;;  %246 = vmatmul.msk.f32.gmra.mxu1 %vm22_vm0, %v16_v20 }
  0xaa   :  { %v204_v21 = vld [vmem:[#allocation2 + $0x8] sm:$0xff] }
  0xab   :  { %219 = vmatpush.msrb.mxu2 %v204_v21 }
  0xad   :  { %220 = vmatpush.msrb.mxu2 %v203_v22 }
  0xae   :  { %256 = vmatmul.msk.f32.vlgmr.msrb.gmra.mxu2 %vm22_vm0, %v14_v14  ;;  %252 = vmatmul.msk.f32.gmra.mxu3 %vm22_vm0, %v16_v20 }
  0xaf   :  { %247 = vmatmul.msk.f32.gmra.mxu1 %vm22_vm0, %v17_v23 }
  0xb6   :  { %257 = vmatmul.msk.f32.gmra.mxu2 %vm22_vm0, %v15_v18  ;;  %253 = vmatmul.msk.f32.gmra.mxu3 %vm22_vm0, %v17_v23 }
  0xbe   :  { %258 = vmatmul.msk.f32.gmra.mxu2 %vm22_vm0, %v16_v20 }
  0xc6   :  { %259 = vmatmul.msk.f32.gmra.mxu2 %vm22_vm0, %v17_v23 }
 0x113   :  { %v86_v24 = vpop.f32.mrf.mxu1 }
 0x114   :  { %98 = vst.msk [vmem:[%s393_s3] sm:$0xff] %vm52_vm1, %v86_v24 }
 0x11b   :  { %v89_v25 = vpop.f32.mrf.mxu1 }
 0x11c   :  { %99 = vst.msk [vmem:[%s393_s3 + $0x8] sm:$0xff] %vm52_vm1, %v89_v25 }
 0x121   :  { %v154_v26 = vpop.f32.mrf.mxu3 }
 0x122   :  { %166 = vst.msk [vmem:[%s393_s3 + $0x20] sm:$0xff] %vm52_vm1, %v154_v26 }
 0x123   :  { %v92_v27 = vpop.f32.mrf.mxu1 }
 0x124   :  { %100 = vst.msk [vmem:[%s393_s3 + $0x10] sm:$0xff] %vm52_vm1, %v92_v27 }
 0x129   :  { %v157_v28 = vpop.f32.mrf.mxu3 }
 0x12a   :  { %167 = vst.msk [vmem:[%s393_s3 + $0x28] sm:$0xff] %vm52_vm1, %v157_v28 }
 0x12c   :  { %v95_v29 = vpop.f32.mrf.mxu1 }
 0x12d   :  { %101 = vst.msk [vmem:[%s393_s3 + $0x18] sm:$0xff] %vm52_vm1, %v95_v29 }
 0x131   :  { %v222_v30 = vpop.f32.mrf.mxu2  ;;  %v160_v31 = vpop.f32.mrf.mxu3 }
 0x132   :  { %234 = vst.msk [vmem:[%s393_s3 + $0x40] sm:$0xff] %vm52_vm1, %v222_v30 }
 0x133   :  { %168 = vst.msk [vmem:[%s393_s3 + $0x30] sm:$0xff] %vm52_vm1, %v160_v31 }
 0x139   :  { %v225_v32 = vpop.f32.mrf.mxu2  ;;  %v163_v33 = vpop.f32.mrf.mxu3 }
 0x13a   :  { %235 = vst.msk [vmem:[%s393_s3 + $0x48] sm:$0xff] %vm52_vm1, %v225_v32 }
 0x13b   :  { %169 = vst.msk [vmem:[%s393_s3 + $0x38] sm:$0xff] %vm52_vm1, %v163_v33 }
 0x141   :  { %v228_v34 = vpop.f32.mrf.mxu2 }
 0x142   :  { %236 = vst.msk [vmem:[%s393_s3 + $0x50] sm:$0xff] %vm52_vm1, %v228_v34 }
 0x149   :  { %v231_v35 = vpop.f32.mrf.mxu2 }
 0x14a   :  { %237 = vst.msk [vmem:[%s393_s3 + $0x58] sm:$0xff] %vm52_vm1, %v231_v35 }

</bundles_post_ra>
